<compile_context>
chip_gen: v6e
topology: v6e:2x2x1
jax: 0.10.0
libtpu: 0.0.40
codegen_flags: <defaults>
</compile_context>

<pallas_src>
import functools

import jax
import jax.numpy as jnp
from jax.experimental import pallas as pl
from jax.experimental.pallas import tpu as pltpu

_LANE = 128
_SUBLANE = 8
_NEG_INF = -1e30
_VMEM_TILE_BUDGET = 32 * 1024 * 1024   # double-buffered tile budget, v7x-safe
_VMEM_LIMIT_BYTES = 48 * 1024 * 1024   # > v5e 16 MiB scoped default, < v7x 64 MiB physical
_MAX_TB = 8192                         # cap on batch-tile rows


def prepare_categorical_params(weight, bias, *, dtype=jnp.float32):
    """One-time parameter prep (do NOT call per forward pass).

    nn.Linear weight [D_out, D_in] -> pre-transposed, lane-dense W_t [D_in, d_pad]
    with d_pad = D_out rounded up to a multiple of 128.  Padded classes get
    zero weight columns and a -1e30 bias so exp() == 0 and they carry no
    probability mass.  dtype=jnp.bfloat16 halves x/W DMA bytes on v6e/v7x.
    """
    d_out, d_in = weight.shape
    d_pad = max(_LANE, ((d_out + _LANE - 1) // _LANE) * _LANE)
    w_t = jnp.asarray(weight).T.astype(dtype)                 # [D_in, D_out]
    bias_f32 = jnp.asarray(bias).astype(jnp.float32)
    if d_pad != d_out:
        w_t = jnp.pad(w_t, ((0, 0), (0, d_pad - d_out)))      # zero-filled padded cols
        bias_f32 = jnp.pad(bias_f32, (0, d_pad - d_out), constant_values=_NEG_INF)
    return w_t, bias_f32.reshape(1, d_pad)


def _choose_tb(batch, d_in, d_pad, itemsize):
    """Pick batch-tile rows: as large as the VMEM budget allows (multiple of 8),
    and split into >=2 grid steps when the batch allows so both v7x TCs get work."""
    fixed = d_in * d_pad * itemsize + d_pad * 4            # single-buffered W_t + bias
    per_row = 2 * (d_in * itemsize + d_pad * 4)            # double-buffered x + out/logits
    tb = (_VMEM_TILE_BUDGET - fixed) // per_row
    tb = int(max(_SUBLANE, min(tb, _MAX_TB)))
    tb = (tb // _SUBLANE) * _SUBLANE
    if tb >= batch:
        if batch >= 2 * _SUBLANE:
            half = -(-batch // 2)                          # ceil(B/2)
            half = -(-half // _SUBLANE) * _SUBLANE         # round up to sublane multiple
            if half < batch:
                return half                                # >= 2 grid steps (megacore)
        return batch                                       # single full-batch block
    return tb


def _const_spec(shape):
    """Grid-invariant input: single-buffer it if this JAX supports pl.Buffered."""
    if hasattr(pl, "Buffered"):
        return pl.BlockSpec(shape, lambda i: (0, 0), pipeline_mode=pl.Buffered(1))
    return pl.BlockSpec(shape, lambda i: (0, 0))


def _categorical_kernel(x_ref, wt_ref, b_ref, o_ref):
    # Linear over the lane-dense padded class dim: [tb, d_in] x [d_in, d_pad] on the MXU.
    logits = jnp.dot(x_ref[...], wt_ref[...],
                     preferred_element_type=jnp.float32) + b_ref[...]
    # Numerically stable softmax; padded classes have logit ~= -1e30 -> exp == 0.
    m = jnp.max(logits, axis=-1, keepdims=True)
    e = jnp.exp(logits - m)
    s = jnp.sum(e, axis=-1, keepdims=True)
    probs = e / s                      # exact normalization (approx recip was >1e-4 off)
    # Store only the true D_out classes: no post-kernel slice / padded HBM writeback.
    o_ref[...] = probs[:, : o_ref.shape[-1]].astype(o_ref.dtype)


@functools.partial(jax.jit, static_argnames=("d_out",))
def categorical_layer_forward(x, w_t, bias_p, *, d_out):
    """Pallas forward of CategoricalLayer1D.

    Args:
      x:      [B, D_in]
      w_t:    [D_in, d_pad]  from prepare_categorical_params (pre-transposed, padded)
      bias_p: [1, d_pad]     from prepare_categorical_params
      d_out:  true number of classes (static)
    Returns:
      (mu,) with mu [B, D_out] float32, rows summing to 1.
    """
    batch, d_in = x.shape
    d_pad = w_t.shape[1]
    x = x.astype(w_t.dtype)            # bf16 input path on v6e/v7x if params prepped bf16
    tb = _choose_tb(batch, d_in, d_pad, jnp.dtype(w_t.dtype).itemsize)
    grid = (pl.cdiv(batch, tb),)

    mu = pl.pallas_call(
        _categorical_kernel,
        out_shape=jax.ShapeDtypeStruct((batch, d_out), jnp.float32),
        grid_spec=pltpu.PrefetchScalarGridSpec(
            num_scalar_prefetch=0,
            grid=grid,
            in_specs=[
                # x: pipelined batch tiles (HBM<->VMEM DMA overlapped with compute).
                pl.BlockSpec((tb, d_in), lambda i: (i, 0)),
                # W_t / bias: grid-invariant, VMEM-resident, single-buffered.
                _const_spec((d_in, d_pad)),
                _const_spec((1, d_pad)),
            ],
            out_specs=pl.BlockSpec((tb, d_out), lambda i: (i, 0)),
        ),
        compiler_params=pltpu.CompilerParams(
            # Batch tiles are independent -> megacore sharding on v7x.
            dimension_semantics=("parallel",),
            vmem_limit_bytes=_VMEM_LIMIT_BYTES,
        ),
    )(x, w_t, bias_p)
    return (mu,)


if __name__ == "__main__":
    # Small shapes implied by the module: pinput['dim']=32, poutput['dim']=16, batch=8.
    B, D_in, D_out = 8, 32, 16

    key = jax.random.PRNGKey(0)
    kx, kw, kb = jax.random.split(key, 3)
    x = jax.random.normal(kx, (B, D_in), dtype=jnp.float32)
    # Deterministic stand-in for init_module(..., 'Sigmoid') (xavier-style init).
    weight = jax.random.normal(kw, (D_out, D_in), dtype=jnp.float32) / jnp.sqrt(D_in)
    bias = jax.random.normal(kb, (D_out,), dtype=jnp.float32) * 0.01

    # One-time parameter prep (transpose + lane-pad), hoisted out of the call path.
    w_t, bias_p = prepare_categorical_params(weight, bias)

    (mu,) = categorical_layer_forward(x, w_t, bias_p, d_out=D_out)
    mu = jax.block_until_ready(mu)

    # Reference check in plain JAX (matches torch Linear + Softmax over last dim).
    ref = jax.nn.softmax(x @ weight.T + bias, axis=-1)
    assert mu.shape == (B, D_out)
    assert jnp.allclose(mu, ref, atol=1e-4, rtol=1e-4), float(jnp.max(jnp.abs(mu - ref)))
    assert jnp.allclose(jnp.sum(mu, axis=-1), 1.0, atol=1e-4)

    print("KERNEL_OK")
</pallas_src>

<mosaic_0001>
module attributes {stable_mosaic.version = 11 : i64} {
  func.func @_categorical_kernel(%arg0: i32, %arg1: memref<8x32xf32, #tpu.memory_space<vmem>>, %arg2: memref<32x128xf32, #tpu.memory_space<vmem>>, %arg3: memref<1x128xf32, #tpu.memory_space<vmem>>, %arg4: memref<8x16xf32, #tpu.memory_space<vmem>>) attributes {dimension_semantics = [#tpu.dimension_semantics<parallel>], iteration_bounds = array<i64: 1>, scalar_prefetch = 0 : i64, scratch_operands = 0 : i64, tpu.core_type = #tpu.core_type<tc>, window_params = [{transform_indices = @transform_0, window_bounds = array<i64: 8, 32>}, {pipeline_mode = #tpu.pipeline_mode<synchronous>, transform_indices = @transform_1, window_bounds = array<i64: 32, 128>}, {pipeline_mode = #tpu.pipeline_mode<synchronous>, transform_indices = @transform_2, window_bounds = array<i64: 1, 128>}, {transform_indices = @transform_3, window_bounds = array<i64: 8, 16>}]} {
    %c0 = arith.constant 0 : index
    %c0_0 = arith.constant 0 : index
    %0 = vector.load %arg1[%c0, %c0_0] : memref<8x32xf32, #tpu.memory_space<vmem>>, vector<8x32xf32>
    %c0_1 = arith.constant 0 : index
    %c0_2 = arith.constant 0 : index
    %1 = vector.load %arg2[%c0_1, %c0_2] : memref<32x128xf32, #tpu.memory_space<vmem>>, vector<32x128xf32>
    %cst = arith.constant dense<0.000000e+00> : vector<8x128xf32>
    %2 = tpu.matmul %0, %1, %cst {dimension_numbers = #tpu.dot_dimension_numbers<[1], [0], [0], [1], [0, 0, 1, 1], [], []>} : vector<8x32xf32>, vector<32x128xf32>, vector<8x128xf32> -> vector<8x128xf32>
    %c0_3 = arith.constant 0 : index
    %c0_4 = arith.constant 0 : index
    %3 = vector.load %arg3[%c0_3, %c0_4] : memref<1x128xf32, #tpu.memory_space<vmem>>, vector<1x128xf32>
    %4 = vector.broadcast %3 : vector<1x128xf32> to vector<8x128xf32>
    %5 = arith.addf %2, %4 : vector<8x128xf32>
    %cst_5 = arith.constant dense<0xFF800000> : vector<8xf32>
    %6 = vector.multi_reduction <maximumf>, %5, %cst_5 [1] : vector<8x128xf32> to vector<8xf32>
    %7 = vector.shape_cast %6 : vector<8xf32> to vector<8x1xf32>
    %8 = vector.broadcast %7 : vector<8x1xf32> to vector<8x128xf32>
    %9 = arith.subf %5, %8 : vector<8x128xf32>
    %10 = math.exp %9 : vector<8x128xf32>
    %cst_6 = arith.constant dense<0.000000e+00> : vector<8xf32>
    %11 = vector.multi_reduction <add>, %10, %cst_6 [1] : vector<8x128xf32> to vector<8xf32>
    %12 = vector.shape_cast %11 : vector<8xf32> to vector<8x1xf32>
    %13 = vector.broadcast %12 : vector<8x1xf32> to vector<8x128xf32>
    %14 = arith.divf %10, %13 : vector<8x128xf32>
    %15 = vector.extract_strided_slice %14 {offsets = [0, 0], sizes = [8, 16], strides = [1, 1]} : vector<8x128xf32> to vector<8x16xf32>
    %c0_7 = arith.constant 0 : index
    %c0_8 = arith.constant 0 : index
    %16 = vector.load %arg4[%c0_7, %c0_8] : memref<8x16xf32, #tpu.memory_space<vmem>>, vector<8x16xf32>
    tpu.vector_store %arg4[%c0_7, %c0_8], %15 {strides = array<i32>} : memref<8x16xf32, #tpu.memory_space<vmem>>, vector<8x16xf32>,
    return
  }
  func.func @transform_0(%arg0: i32) -> (i32, i32) {
    %c0_i32 = arith.constant 0 : i32
    %c0_i32_0 = arith.constant 0 : i32
    return %arg0, %c0_i32 : i32, i32
  }
  func.func @transform_1(%arg0: i32) -> (i32, i32) {
    %c0_i32 = arith.constant 0 : i32
    %c0_i32_0 = arith.constant 0 : i32
    %c0_i32_1 = arith.constant 0 : i32
    return %c0_i32, %c0_i32_0 : i32, i32
  }
  func.func @transform_2(%arg0: i32) -> (i32, i32) {
    %c0_i32 = arith.constant 0 : i32
    %c0_i32_0 = arith.constant 0 : i32
    %c0_i32_1 = arith.constant 0 : i32
    return %c0_i32, %c0_i32_0 : i32, i32
  }
  func.func @transform_3(%arg0: i32) -> (i32, i32) {
    %c0_i32 = arith.constant 0 : i32
    %c0_i32_0 = arith.constant 0 : i32
    return %arg0, %c0_i32 : i32, i32
  }
}

</mosaic_0001>

<bundles_post_ra>
// kernel: categorical_layer_forward.1
= control target key start
LH: loop header
LB: loop body
LE: loop exit
PB: predicated region body
PF: predicated region fallthrough
CT: control target
= control target key end

     0   :  { %8 = vsyncpa [#allocation3], 0  ;;  %s288_s0 = inlined_call_operand.hbm [shape: f32[8,32], index: 0, kind: input, shape index: {}]   ;;  %s289_s1 = inlined_call_operand.hbm [shape: f32[32,128], index: 1, kind: input, shape index: {}]   ;;  %s290_s2 = inlined_call_operand.vmem [shape: f32[1,128], index: 2, kind: input, shape index: {}]   ;;  %s291_s3 = inlined_call_operand.hbm [shape: f32[8,16], index: 3, kind: output, shape index: {}]  }
   0x1   :  { %9 = vsyncpa [#allocation6], 0 }
   0x2   :  { %10 = vsyncpa [#allocation4], 0  ;;  %s249_s12 = smov [#allocation2]   ;;  %s250_s14 = smov [#allocation5]  }
   0x3   :  { %s17_s13 = sshll.u32 %s249_s12, 4  ;;  %s26_s15 = sshll.u32 %s250_s14, 4  ;;  %s18_s13 = int_to_ptr.vmem [resolvable:$true] %s17_s13  ;;  %s27_s15 = int_to_ptr.vmem [resolvable:$true] %s26_s15 }
   0x4   :  { %s191_s16 = scalar_lea.vmem %s18_s13, 128  ;;  %p196_p1 = scmp.lt.s32.totalorder %s18_s13, %s18_s13 }
   0x5   :  { %p192_p0 = scmp.ne.s32.totalorder %s18_s13, %s191_s16  ;;  %p197_p2 = scmp.lt.s32.totalorder %s191_s16, %s191_s16 }
   0x7   :  { %p198_p3 = por %p197_p2, %p196_p1 }
   0x9   :  { %p199_p4 = pnand %p198_p3, %p192_p0 }
   0xb   :  { %202 = shalt.err (!%p199_p4)
}
   0xc   :  { %20 = dma.hbm_to_vmem [thread:$0]  %s288_s0, 128, %s18_s13, [#allocation3]  }
   0xd   :  { %s211_s19 = scalar_lea.vmem %s27_s15, 512  ;;  %p216_p6 = scmp.lt.s32.totalorder %s27_s15, %s27_s15 }
   0xe   :  { %p212_p5 = scmp.ne.s32.totalorder %s27_s15, %s211_s19  ;;  %p217_p7 = scmp.lt.s32.totalorder %s211_s19, %s211_s19 }
  0x10   :  { %p218_p8 = por %p217_p7, %p216_p6 }
  0x12   :  { %p219_p9 = pnand %p218_p8, %p212_p5 }
  0x14   :  { %222 = shalt.err (!%p219_p9)
}
  0x15   :  { %s251_s20 = smov 128   ;;  %s252_s21 = smov 8  }
  0x16   :  { %32 = dma.hbm_to_vmem [thread:$0]  %s289_s1, 512, %s27_s15, [#allocation6], %s251_s20, %s251_s20, %s252_s21  }
  0x17   :  { %243 = dma.done.wait [#allocation3], 128  }
  0x18   :  { %244 = vsyncadd [#allocation3], 4294967168 }
  0x19   :  { %245 = dma.done.wait [#allocation6], 512  }
  0x1a   :  { %246 = vsyncadd [#allocation6], 4294966784  ;;  %v253_v0 = vmov 0.0   ;;  %vm254_vm0 = vmmov 0   ;;  %v45_v1 = vld [vmem:[#allocation5 + $0x18] sm:$0xff]  ;;  %v44_v2 = vld [vmem:[#allocation5 + $0x10] sm:$0xff] }
  0x1b   :  { %161 = vmatprep.subr.mxu0 %v253_v0  ;;  %169 = vmatprep.mubr.msk.f32.mxu0 %vm254_vm0, %v253_v0  ;;  %v43_v3 = vld [vmem:[#allocation5 + $0x8] sm:$0xff]  ;;  %v42_v4 = vld [vmem:[#allocation5] sm:$0xff]  ;;  %v41_v5 = vld [vmem:[#allocation2] sm:$0xff]  ;;  %vm53_vm1 = vcmask 261120   ;;  %s255_s24 = smov [#allocation7]   ;;  %vm136_vm2 = vcmask 130048  }
  0x1c   :  { %162 = vmatpush3.msra.mxu0 %v45_v1  ;;  %v154_v6 = vld [vmem:[%s290_s2] ss:$0 sm:$0xff]  ;;  %s144_s25 = sshll.u32 %s255_s24, 4  ;;  %s145_s25 = int_to_ptr.vmem [resolvable:$true] %s144_s25 }
  0x1d   :  { %163 = vmatprep.subr.mxu0 %v253_v0  ;;  %s223_s2 = scalar_lea.vmem %s145_s25, 128  ;;  %p228_p11 = scmp.lt.s32.totalorder %s145_s25, %s145_s25 }
  0x1e   :  { %164 = vmatpush3.msra.mxu0 %v44_v2  ;;  %p224_p10 = scmp.ne.s32.totalorder %s145_s25, %s223_s2  ;;  %p229_p12 = scmp.lt.s32.totalorder %s223_s2, %s223_s2 }
  0x1f   :  { %165 = vmatprep.subr.mxu0 %v253_v0 }
  0x20   :  { %166 = vmatpush3.msra.mxu0 %v43_v3  ;;  %p230_p13 = por %p229_p12, %p228_p11 }
  0x21   :  { %167 = vmatprep.subr.mxu0 %v253_v0 }
  0x22   :  { %168 = vmatpush3.msra.mxu0 %v42_v4  ;;  %p231_p0 = pnand %p230_p13, %p224_p10 }
  0x23   :  { %170 = vmatmul.mubr.msk.f32.vlgmr.msra.gmra.mxu0 %vm53_vm1, %v41_v5 }
  0xe3   :  { %v123_v7 = vpop.f32.mrf.mxu0 }
  0xe4   :  { %v124_v8 = vadd.f32 %v154_v6, %v123_v7 }
  0xe5   :  { %v171_v9 = vpop.f32.mrf.mxu0 }
  0xe6   :  { %127 = vmax.xlane.f32.xlu0 %v124_v8 }
 0x16f   :  { %v128_v10 = vpop.xlane.xlu0 %127 }
 0x170   :  { %v129_v11 = vsub.f32 %v124_v8, %v128_v10 }
 0x172   :  { %v130_v12 = vmul.f32 1.442695, %v129_v11 }
 0x174   :  { %179 = vpow2.f32 %v130_v12 }
 0x181   :  { %v180_v13 = vpop.eup %179 }
 0x182   :  { %132 = vadd.xlane.f32.xlu0 %v180_v13 }
 0x20b   :  { %v133_v14 = vpop.xlane.xlu0 %132 }
 0x20c   :  { %181 = vrcp.f32 %v133_v14 }
 0x219   :  { %v182_v15 = vpop.eup %181 }
 0x21a   :  { %v135_v16 = vmul.f32 %v182_v15, %v180_v13 }
 0x21c   :  { %137 = vst.msk [vmem:[#allocation7] sm:$0xff] %vm136_vm2, %v135_v16 }
 0x21d   :  { %234 = shalt.err (!%p231_p0)
}
 0x21e   :  { %147 = dma.vmem_to_hbm [thread:$0]  %s145_s25, 128, %s291_s3, [#allocation4]  }
 0x21f   :  { %247 = dma.done.wait [#allocation4], 128  }
 0x220   :  { %248 = vsyncadd [#allocation4], 4294967168 }
 0x221   :  { %151 = vsyncpa [#allocation3], 1 }
 0x222   :  { %152 = vsyncpa [#allocation6], 1 }
 0x223   :  { %153 = vsyncpa [#allocation4], 1 }

</bundles_post_ra>
